<compile_context>
chip_gen: v7x
topology: tpu7x:2x2x1
jax: 0.10.0
libtpu: 0.0.40
codegen_flags: <defaults>
</compile_context>

<pallas_src>
import functools

import jax
import jax.numpy as jnp
from jax.experimental import pallas as pl
from jax.experimental.pallas import tpu as pltpu

NUM_CLASSES = 6
_LANES = 128
_TARGET_BLOCK_BYTES = 512 * 1024  # ~roofline-sized grid-step block


def _presence_kernel(tgt_ref, pres_ref, *, num_classes):
    # tgt_ref : (Bt, Rt, 128) integer class-index labels (pad sentinel = -1)
    # pres_ref: (1, Bt, C) f32 per-class presence, max-accumulated over chunks
    k = pl.program_id(1)

    @pl.when(k == 0)
    def _():
        pres_ref[...] = jnp.zeros_like(pres_ref)

    tgt = tgt_ref[...]                                  # native int dtype

    cols = []
    for c in range(num_classes):                        # C is small & static
        hit = (tgt == c).astype(jnp.float32)            # 1 cmp + 1 cast / pixel
        m = jnp.max(hit, axis=2)                        # lane reduce (XLU)
        m = jnp.max(m, axis=1, keepdims=True)           # sublane reduce -> (Bt, 1)
        cols.append(m)
    pres = jnp.concatenate(cols, axis=1)                # (Bt, C)
    pres_ref[...] = jnp.maximum(pres_ref[...], pres[None])


def _choose_tiling(batch, rows, itemsize):
    """Pick (batch_tile, row_tile) giving ~512 KiB per grid step."""
    row_bytes = _LANES * itemsize
    elem_bytes = rows * row_bytes
    if elem_bytes <= _TARGET_BLOCK_BYTES:
        # Small images: whole spatial plane per step, block several batch elems.
        rt = rows
        bt = min(batch, max(1, _TARGET_BLOCK_BYTES // max(elem_bytes, 1)))
    else:
        # Large images: one batch elem per step, chunk rows (Rt multiple of 8).
        bt = 1
        rt = max(8, (_TARGET_BLOCK_BYTES // row_bytes) // 8 * 8)
        rt = min(rt, ((rows + 7) // 8) * 8)
    return bt, rt


def se_loss(pred, target, num_classes=NUM_CLASSES):
    """pred: (B, C) float logits. target: (B, H, W) integer class-index map."""
    B, C = pred.shape
    assert C == num_classes
    tb, H, W = target.shape
    assert tb == B

    if not jnp.issubdtype(target.dtype, jnp.integer):
        # TODO(synk): non-integer float labels use torch.histc's fractional
        # scale/floor binning; integer-valued labels (the normal case) are
        # exact after this cast.
        target = target.astype(jnp.int32)

    # Lane-dense layout: (B, H, W) -> (B, R, 128), pad tail with -1 sentinel.
    hw = H * W
    hw_pad = pl.cdiv(hw, _LANES) * _LANES
    flat = target.reshape(B, hw)
    if hw_pad != hw:
        flat = jnp.pad(flat, ((0, 0), (0, hw_pad - hw)), constant_values=-1)
    R = hw_pad // _LANES
    lbl = flat.reshape(B, R, _LANES)

    bt, rt = _choose_tiling(B, R, lbl.dtype.itemsize)
    b_pad = pl.cdiv(B, bt) * bt
    r_pad = pl.cdiv(R, rt) * rt
    if b_pad != B or r_pad != R:
        lbl = jnp.pad(lbl, ((0, b_pad - B), (0, r_pad - R), (0, 0)),
                      constant_values=-1)

    gb = b_pad // bt      # batch grid (parallel — independent output blocks)
    gk = r_pad // rt      # row-chunk grid (arbitrary — presence accumulator)

    kernel = functools.partial(_presence_kernel, num_classes=C)

    pres = pl.pallas_call(
        kernel,
        out_shape=jax.ShapeDtypeStruct((gb, bt, C), jnp.float32),
        grid_spec=pltpu.PrefetchScalarGridSpec(
            num_scalar_prefetch=0,
            grid=(gb, gk),
            in_specs=[pl.BlockSpec((bt, rt, _LANES), lambda b, k: (b, k, 0))],
            out_specs=pl.BlockSpec((1, bt, C), lambda b, k: (b, 0, 0)),
        ),
        compiler_params=pltpu.CompilerParams(
            dimension_semantics=("parallel", "arbitrary")),
    )(lbl)

    tvect = pres.reshape(b_pad, C)[:B]                  # (B, C) presence
    p = pred.astype(jnp.float32)
    # BCE(sigmoid(p), t) in the numerically stable logits form.
    # (PyTorch clamps log() at -100; identical for non-extreme logits.)
    bce = jnp.maximum(p, 0.0) - p * tvect + jnp.log1p(jnp.exp(-jnp.abs(p)))
    return jnp.mean(bce)


def _reference_se_loss(pred, target, num_classes=NUM_CLASSES):
    # Pure-JAX reference matching the PyTorch semantics (integer labels).
    B, C = pred.shape
    tgt = target.astype(jnp.int32)
    cls = jnp.arange(C, dtype=jnp.int32)
    match = tgt[..., None] == cls                               # (B, H, W, C)
    tvect = jnp.any(match, axis=(1, 2)).astype(jnp.float32)     # (B, C)
    p = pred.astype(jnp.float32)
    bce = jnp.maximum(p, 0.0) - p * tvect + jnp.log1p(jnp.exp(-jnp.abs(p)))
    return jnp.mean(bce)


if __name__ == "__main__":
    key = jax.random.PRNGKey(0)
    k1, k2 = jax.random.split(key)

    B, C, H, W = 2, NUM_CLASSES, 16, 16
    pred = jax.random.normal(k1, (B, C), dtype=jnp.float32)
    target = jax.random.randint(k2, (B, H, W), 0, C, dtype=jnp.int32)

    loss = se_loss(pred, target)
    jax.block_until_ready(loss)

    ref = _reference_se_loss(pred, target)
    assert jnp.allclose(loss, ref, rtol=1e-5, atol=1e-6), (loss, ref)

    print("KERNEL_OK")
</pallas_src>

<mosaic_0001>
module attributes {stable_mosaic.version = 11 : i64} {
  func.func @_presence_kernel(%arg0: i32, %arg1: i32, %arg2: memref<2x2x128xi32, #tpu.memory_space<vmem>>, %arg3: memref<1x2x6xf32, #tpu.memory_space<vmem>>) attributes {dimension_semantics = [#tpu.dimension_semantics<parallel>, #tpu.dimension_semantics<arbitrary>], iteration_bounds = array<i64: 1, 1>, scalar_prefetch = 0 : i64, scratch_operands = 0 : i64, tpu.core_type = #tpu.core_type<tc>, window_params = [{transform_indices = @transform_0, window_bounds = array<i64: 2, 2, 128>}, {transform_indices = @transform_1, window_bounds = array<i64: 1, 2, 6>}]} {
    %c0_i32 = arith.constant 0 : i32
    %0 = arith.cmpi eq, %arg1, %c0_i32 : i32
    %1 = arith.extui %0 : i1 to i32
    %c0_i32_0 = arith.constant 0 : i32
    %2 = arith.cmpi ne, %1, %c0_i32_0 : i32
    scf.if %2 {
      %cst_21 = arith.constant 0.000000e+00 : f32
      %51 = vector.broadcast %cst_21 : f32 to vector<1x2x6xf32>
      %c0_22 = arith.constant 0 : index
      %c0_23 = arith.constant 0 : index
      %c0_24 = arith.constant 0 : index
      %52 = vector.load %arg3[%c0_22, %c0_23, %c0_24] : memref<1x2x6xf32, #tpu.memory_space<vmem>>, vector<1x2x6xf32>
      tpu.vector_store %arg3[%c0_22, %c0_23, %c0_24], %51 {strides = array<i32>} : memref<1x2x6xf32, #tpu.memory_space<vmem>>, vector<1x2x6xf32>,
    } else {
    }
    %c0 = arith.constant 0 : index
    %c0_1 = arith.constant 0 : index
    %c0_2 = arith.constant 0 : index
    %3 = vector.load %arg2[%c0, %c0_1, %c0_2] : memref<2x2x128xi32, #tpu.memory_space<vmem>>, vector<2x2x128xi32>
    %c0_i32_3 = arith.constant 0 : i32
    %4 = vector.broadcast %c0_i32_3 : i32 to vector<2x2x128xi32>
    %5 = arith.cmpi eq, %3, %4 : vector<2x2x128xi32>
    %6 = arith.extui %5 : vector<2x2x128xi1> to vector<2x2x128xi32>
    %7 = arith.sitofp %6 : vector<2x2x128xi32> to vector<2x2x128xf32>
    %cst = arith.constant dense<0xFF800000> : vector<2x2xf32>
    %8 = vector.multi_reduction <maximumf>, %7, %cst [2] : vector<2x2x128xf32> to vector<2x2xf32>
    %cst_4 = arith.constant dense<0xFF800000> : vector<2xf32>
    %9 = vector.multi_reduction <maximumf>, %8, %cst_4 [1] : vector<2x2xf32> to vector<2xf32>
    %10 = vector.shape_cast %9 : vector<2xf32> to vector<2x1xf32>
    %c1_i32 = arith.constant 1 : i32
    %11 = vector.broadcast %c1_i32 : i32 to vector<2x2x128xi32>
    %12 = arith.cmpi eq, %3, %11 : vector<2x2x128xi32>
    %13 = arith.extui %12 : vector<2x2x128xi1> to vector<2x2x128xi32>
    %14 = arith.sitofp %13 : vector<2x2x128xi32> to vector<2x2x128xf32>
    %cst_5 = arith.constant dense<0xFF800000> : vector<2x2xf32>
    %15 = vector.multi_reduction <maximumf>, %14, %cst_5 [2] : vector<2x2x128xf32> to vector<2x2xf32>
    %cst_6 = arith.constant dense<0xFF800000> : vector<2xf32>
    %16 = vector.multi_reduction <maximumf>, %15, %cst_6 [1] : vector<2x2xf32> to vector<2xf32>
    %17 = vector.shape_cast %16 : vector<2xf32> to vector<2x1xf32>
    %c2_i32 = arith.constant 2 : i32
    %18 = vector.broadcast %c2_i32 : i32 to vector<2x2x128xi32>
    %19 = arith.cmpi eq, %3, %18 : vector<2x2x128xi32>
    %20 = arith.extui %19 : vector<2x2x128xi1> to vector<2x2x128xi32>
    %21 = arith.sitofp %20 : vector<2x2x128xi32> to vector<2x2x128xf32>
    %cst_7 = arith.constant dense<0xFF800000> : vector<2x2xf32>
    %22 = vector.multi_reduction <maximumf>, %21, %cst_7 [2] : vector<2x2x128xf32> to vector<2x2xf32>
    %cst_8 = arith.constant dense<0xFF800000> : vector<2xf32>
    %23 = vector.multi_reduction <maximumf>, %22, %cst_8 [1] : vector<2x2xf32> to vector<2xf32>
    %24 = vector.shape_cast %23 : vector<2xf32> to vector<2x1xf32>
    %c3_i32 = arith.constant 3 : i32
    %25 = vector.broadcast %c3_i32 : i32 to vector<2x2x128xi32>
    %26 = arith.cmpi eq, %3, %25 : vector<2x2x128xi32>
    %27 = arith.extui %26 : vector<2x2x128xi1> to vector<2x2x128xi32>
    %28 = arith.sitofp %27 : vector<2x2x128xi32> to vector<2x2x128xf32>
    %cst_9 = arith.constant dense<0xFF800000> : vector<2x2xf32>
    %29 = vector.multi_reduction <maximumf>, %28, %cst_9 [2] : vector<2x2x128xf32> to vector<2x2xf32>
    %cst_10 = arith.constant dense<0xFF800000> : vector<2xf32>
    %30 = vector.multi_reduction <maximumf>, %29, %cst_10 [1] : vector<2x2xf32> to vector<2xf32>
    %31 = vector.shape_cast %30 : vector<2xf32> to vector<2x1xf32>
    %c4_i32 = arith.constant 4 : i32
    %32 = vector.broadcast %c4_i32 : i32 to vector<2x2x128xi32>
    %33 = arith.cmpi eq, %3, %32 : vector<2x2x128xi32>
    %34 = arith.extui %33 : vector<2x2x128xi1> to vector<2x2x128xi32>
    %35 = arith.sitofp %34 : vector<2x2x128xi32> to vector<2x2x128xf32>
    %cst_11 = arith.constant dense<0xFF800000> : vector<2x2xf32>
    %36 = vector.multi_reduction <maximumf>, %35, %cst_11 [2] : vector<2x2x128xf32> to vector<2x2xf32>
    %cst_12 = arith.constant dense<0xFF800000> : vector<2xf32>
    %37 = vector.multi_reduction <maximumf>, %36, %cst_12 [1] : vector<2x2xf32> to vector<2xf32>
    %38 = vector.shape_cast %37 : vector<2xf32> to vector<2x1xf32>
    %c5_i32 = arith.constant 5 : i32
    %39 = vector.broadcast %c5_i32 : i32 to vector<2x2x128xi32>
    %40 = arith.cmpi eq, %3, %39 : vector<2x2x128xi32>
    %41 = arith.extui %40 : vector<2x2x128xi1> to vector<2x2x128xi32>
    %42 = arith.sitofp %41 : vector<2x2x128xi32> to vector<2x2x128xf32>
    %cst_13 = arith.constant dense<0xFF800000> : vector<2x2xf32>
    %43 = vector.multi_reduction <maximumf>, %42, %cst_13 [2] : vector<2x2x128xf32> to vector<2x2xf32>
    %cst_14 = arith.constant dense<0xFF800000> : vector<2xf32>
    %44 = vector.multi_reduction <maximumf>, %43, %cst_14 [1] : vector<2x2xf32> to vector<2xf32>
    %45 = vector.shape_cast %44 : vector<2xf32> to vector<2x1xf32>
    %46 = tpu.concatenate %10, %17, %24, %31, %38, %45 in 1 : vector<2x1xf32>, vector<2x1xf32>, vector<2x1xf32>, vector<2x1xf32>, vector<2x1xf32>, vector<2x1xf32> -> vector<2x6xf32>
    %c0_15 = arith.constant 0 : index
    %c0_16 = arith.constant 0 : index
    %c0_17 = arith.constant 0 : index
    %47 = vector.load %arg3[%c0_15, %c0_16, %c0_17] : memref<1x2x6xf32, #tpu.memory_space<vmem>>, vector<1x2x6xf32>
    %48 = vector.shape_cast %46 : vector<2x6xf32> to vector<1x2x6xf32>
    %49 = arith.maximumf %47, %48 : vector<1x2x6xf32>
    %c0_18 = arith.constant 0 : index
    %c0_19 = arith.constant 0 : index
    %c0_20 = arith.constant 0 : index
    %50 = vector.load %arg3[%c0_18, %c0_19, %c0_20] : memref<1x2x6xf32, #tpu.memory_space<vmem>>, vector<1x2x6xf32>
    tpu.vector_store %arg3[%c0_18, %c0_19, %c0_20], %49 {strides = array<i32>} : memref<1x2x6xf32, #tpu.memory_space<vmem>>, vector<1x2x6xf32>,
    return
  }
  func.func @transform_0(%arg0: i32, %arg1: i32) -> (i32, i32, i32) {
    %c0_i32 = arith.constant 0 : i32
    %c0_i32_0 = arith.constant 0 : i32
    return %arg0, %arg1, %c0_i32 : i32, i32, i32
  }
  func.func @transform_1(%arg0: i32, %arg1: i32) -> (i32, i32, i32) {
    %c0_i32 = arith.constant 0 : i32
    %c0_i32_0 = arith.constant 0 : i32
    %c0_i32_1 = arith.constant 0 : i32
    return %arg0, %c0_i32, %c0_i32_0 : i32, i32, i32
  }
}

</mosaic_0001>

<bundles_post_ra>
// kernel: tpu_custom_call.1
= control target key start
LH: loop header
LB: loop body
LE: loop exit
PB: predicated region body
PF: predicated region fallthrough
CT: control target
= control target key end

     0   :  { %6 = vsyncpa [#allocation3], 0  ;;  %s357_s0 = inlined_call_operand.hbm [shape: s32[2,2,128], index: 0, kind: input, shape index: {}]   ;;  %s358_s1 = inlined_call_operand.hbm [shape: f32[1,2,6], index: 1, kind: output, shape index: {}]  }
   0x1   :  { %7 = vsyncpa [#allocation4], 0  ;;  %s292_s6 = smov [#allocation2]   ;;  %s244_s10 = scalar_lea.hbm %s357_s0, 64 }
   0x2   :  { %s13_s7 = sshll.u32 %s292_s6, 4  ;;  %p245_p0 = scmp.ne.s32.totalorder %s357_s0, %s244_s10  ;;  %s14_s7 = int_to_ptr.vmem [resolvable:$true] %s13_s7 }
   0x3   :  { %p248_p1 = scmp.lt.u32.totalorder %s244_s10, %s357_s0 }
   0x5   :  { %p250_p2 = pnand %p248_p1, %p245_p0 }
   0x7   :  { %253 = shalt.err (!%p250_p2)
}
   0x8   :  { %s254_s15 = scalar_lea.vmem %s14_s7, 64  ;;  %p259_p4 = scmp.lt.s32.totalorder %s14_s7, %s14_s7 }
   0x9   :  { %p255_p3 = scmp.ne.s32.totalorder %s14_s7, %s254_s15  ;;  %p260_p5 = scmp.lt.s32.totalorder %s254_s15, %s254_s15 }
   0xb   :  { %p261_p6 = por %p260_p5, %p259_p4 }
   0xd   :  { %p262_p7 = pnand %p261_p6, %p255_p3 }
   0xf   :  { %265 = shalt.err (!%p262_p7)
}
  0x10   :  { %s293_s16 = smov 32   ;;  %s294_s17 = smov 2  }
  0x11   :  { %19 = dma.hbm_to_vmem [thread:$0]  %s357_s0, 64, %s14_s7, [#allocation3], %s293_s16, %s293_s16, %s294_s17  }
  0x12   :  { %288 = dma.done.wait [#allocation3], 64  }
  0x13   :  { %289 = vsyncadd [#allocation3], 4294967232  ;;  %vm27_vm0 = vcmask 41984   ;;  %v295_v0 = vmov 0.0   ;;  %v29_v1 = vld [vmem:[#allocation2] sm:$0x3]  ;;  %v46_v27 = vlaneseq }
  0x14   :  { %28 = vst.msk [vmem:[#allocation5] sm:$0x3] %vm27_vm0, %v295_v0  ;;  %vm37_vm1 = vcmask 1041408   ;;  %v30_v2 = vld [vmem:[#allocation2 + $0x2] sm:$0x3]  ;;  %vm63_vm2 = vcmp.eq.s32.totalorder %v29_v1, 1 }
  0x15   :  { %vm31_vm3 = vcmp.eq.s32.totalorder %v29_v1, 0  ;;  %vm64_vm4 = vcmp.eq.s32.totalorder %v30_v2, 1  ;;  %vm32_vm5 = vcmp.eq.s32.totalorder %v30_v2, 0  ;;  %v229_v3 = vsel %vm63_vm2, 1.0, %v295_v0  ;;  %s296_s0 = smov [#allocation5]  }
  0x16   :  { %v227_v4 = vsel %vm31_vm3, 1.0, %v295_v0  ;;  %v230_v5 = vsel %vm64_vm4, 1.0, %v295_v0  ;;  %v228_v6 = vsel %vm32_vm5, 1.0, %v295_v0  ;;  %v69_v7 = vsel %vm37_vm1, %v229_v3, -inf  ;;  %s218_s20 = sshll.u32 %s296_s0, 4  ;;  %s219_s20 = int_to_ptr.vmem [resolvable:$true] %s218_s20 }
  0x17   :  { %v38_v8 = vsel %vm37_vm1, %v227_v4, -inf  ;;  %70 = vmax.xlane.f32.xlu1 %v69_v7  ;;  %vm91_vm6 = vcmp.eq.s32.totalorder %v30_v2, 2  ;;  %vm90_vm7 = vcmp.eq.s32.totalorder %v29_v1, 2  ;;  %v72_v9 = vsel %vm37_vm1, %v230_v5, -inf  ;;  %s266_s21 = scalar_lea.vmem %s219_s20, 32  ;;  %p271_p9 = scmp.lt.s32.totalorder %s219_s20, %s219_s20 }
  0x18   :  { %39 = vmax.xlane.f32.xlu0 %v38_v8  ;;  %v41_v10 = vsel %vm37_vm1, %v228_v6, -inf  ;;  %v232_v11 = vsel %vm91_vm6, 1.0, %v295_v0  ;;  %v231_v12 = vsel %vm90_vm7, 1.0, %v295_v0  ;;  %vm118_vm8 = vcmp.eq.s32.totalorder %v30_v2, 3  ;;  %p267_p8 = scmp.ne.s32.totalorder %s219_s20, %s266_s21  ;;  %p272_p10 = scmp.lt.s32.totalorder %s266_s21, %s266_s21 }
  0x19   :  { %vm117_vm9 = vcmp.eq.s32.totalorder %v29_v1, 3  ;;  %v99_v13 = vsel %vm37_vm1, %v232_v11, -inf  ;;  %v96_v14 = vsel %vm37_vm1, %v231_v12, -inf  ;;  %v234_v15 = vsel %vm118_vm8, 1.0, %v295_v0 }
  0x1a   :  { %v233_v16 = vsel %vm117_vm9, 1.0, %v295_v0  ;;  %vm145_vm10 = vcmp.eq.s32.totalorder %v30_v2, 4  ;;  %vm144_vm11 = vcmp.eq.s32.totalorder %v29_v1, 4  ;;  %v126_v17 = vsel %vm37_vm1, %v234_v15, -inf  ;;  %p273_p11 = por %p272_p10, %p271_p9 }
  0x1b   :  { %73 = vmax.xlane.f32.xlu1 %v72_v9  ;;  %v123_v18 = vsel %vm37_vm1, %v233_v16, -inf  ;;  %v236_v19 = vsel %vm145_vm10, 1.0, %v295_v0  ;;  %v235_v20 = vsel %vm144_vm11, 1.0, %v295_v0  ;;  %vm172_vm12 = vcmp.eq.s32.totalorder %v30_v2, 5  ;;  %v208_v11 = vld [vmem:[#allocation5] sm:$0x3] }
  0x1c   :  { %42 = vmax.xlane.f32.xlu0 %v41_v10  ;;  %vm171_vm13 = vcmp.eq.s32.totalorder %v29_v1, 5  ;;  %v153_v21 = vsel %vm37_vm1, %v236_v19, -inf  ;;  %v150_v22 = vsel %vm37_vm1, %v235_v20, -inf  ;;  %v238_v23 = vsel %vm172_vm12, 1.0, %v295_v0  ;;  %p274_p12 = pnand %p273_p11, %p267_p8 }
  0x1d   :  { %v237_v24 = vsel %vm171_vm13, 1.0, %v295_v0  ;;  %v180_v25 = vsel %vm37_vm1, %v238_v23, -inf  ;;  %v47_v28 = vand.u32 127, %v46_v27  ;;  %v49_v29 = vshrl.u32 %v46_v27, 7 }
  0x1e   :  { %v177_v26 = vsel %vm37_vm1, %v237_v24, -inf  ;;  %vm56_vm14 = vcmask 1041409   ;;  %vm59_vm15 = vcmask 9216   ;;  %vm198_vm1 = vcmask 7168  }
  0x1f   :  { %100 = vmax.xlane.f32.xlu1 %v99_v13  ;;  %v50_v32 = vsub.s32 %v47_v28, %v49_v29  ;;  %vm200_vm2 = vcmask 15360   ;;  %vm202_vm3 = vcmask 23552   ;;  %vm204_vm4 = vcmask 31744  }
  0x20   :  { %97 = vmax.xlane.f32.xlu0 %v96_v14  ;;  %vm206_vm5 = vcmask 39936  }
  0x23   :  { %127 = vmax.xlane.f32.xlu1 %v126_v17 }
  0x24   :  { %124 = vmax.xlane.f32.xlu0 %v123_v18 }
  0x27   :  { %154 = vmax.xlane.f32.xlu1 %v153_v21 }
  0x28   :  { %151 = vmax.xlane.f32.xlu0 %v150_v22 }
  0x2b   :  { %181 = vmax.xlane.f32.xlu1 %v180_v25 }
  0x2c   :  { %178 = vmax.xlane.f32.xlu0 %v177_v26 }
  0xa4   :  { %v71_v30 = vpop.xlane.xlu1 %70 }
  0xa5   :  { %v40_v31 = vpop.xlane.xlu0 %39  ;;  %v80_v35 = vrot.slane %v71_v30, %v50_v32 }
  0xa6   :  { %v51_v36 = vrot.slane %v40_v31, %v50_v32 }
  0xa8   :  { %v74_v33 = vpop.xlane.xlu1 %73 }
  0xa9   :  { %v43_v34 = vpop.xlane.xlu0 %42  ;;  %v84_v37 = vrot.slane %v74_v33, %v50_v32 }
  0xaa   :  { %v55_v38 = vrot.slane %v43_v34, %v50_v32 }
  0xab   :  { %v85_v39 = vsel %vm56_vm14, %v84_v37, %v80_v35 }
  0xac   :  { %v57_v40 = vsel %vm56_vm14, %v55_v38, %v51_v36  ;;  %v101_v41 = vpop.xlane.xlu1 %100  ;;  %v87_v43 = vsel %vm59_vm15, %v85_v39, -inf }
  0xad   :  { %v98_v42 = vpop.xlane.xlu0 %97  ;;  %v60_v44 = vsel %vm59_vm15, %v57_v40, -inf  ;;  %v111_v45 = vrot.slane %v101_v41, %v50_v32  ;;  %88 = vmax.xlane.f32.xlu1 %v87_v43 }
  0xae   :  { %v107_v46 = vrot.slane %v98_v42, %v50_v32  ;;  %61 = vmax.xlane.f32.xlu0 %v60_v44 }
  0xb0   :  { %v112_v47 = vsel %vm56_vm14, %v111_v45, %v107_v46  ;;  %v128_v48 = vpop.xlane.xlu1 %127 }
  0xb1   :  { %v125_v49 = vpop.xlane.xlu0 %124  ;;  %v114_v50 = vsel %vm59_vm15, %v112_v47, -inf  ;;  %v138_v51 = vrot.slane %v128_v48, %v50_v32 }
  0xb2   :  { %v134_v52 = vrot.slane %v125_v49, %v50_v32  ;;  %115 = vmax.xlane.f32.xlu0 %v114_v50 }
  0xb4   :  { %v139_v53 = vsel %vm56_vm14, %v138_v51, %v134_v52  ;;  %v155_v54 = vpop.xlane.xlu1 %154 }
  0xb5   :  { %v152_v55 = vpop.xlane.xlu0 %151  ;;  %v141_v56 = vsel %vm59_vm15, %v139_v53, -inf  ;;  %v165_v57 = vrot.slane %v155_v54, %v50_v32 }
  0xb6   :  { %v161_v58 = vrot.slane %v152_v55, %v50_v32  ;;  %142 = vmax.xlane.f32.xlu1 %v141_v56 }
  0xb8   :  { %v166_v59 = vsel %vm56_vm14, %v165_v57, %v161_v58  ;;  %v182_v60 = vpop.xlane.xlu1 %181 }
  0xb9   :  { %v179_v61 = vpop.xlane.xlu0 %178  ;;  %v168_v62 = vsel %vm59_vm15, %v166_v59, -inf  ;;  %v192_v63 = vrot.slane %v182_v60, %v50_v32 }
  0xba   :  { %v188_v0 = vrot.slane %v179_v61, %v50_v32  ;;  %169 = vmax.xlane.f32.xlu0 %v168_v62 }
  0xbc   :  { %v193_v1 = vsel %vm56_vm14, %v192_v63, %v188_v0 }
  0xbd   :  { %v195_v2 = vsel %vm59_vm15, %v193_v1, -inf }
  0xbe   :  { %196 = vmax.xlane.f32.xlu1 %v195_v2 }
 0x13a   :  { %v89_v4 = vpop.xlane.xlu1 %88 }
 0x13b   :  { %v62_v3 = vpop.xlane.xlu0 %61 }
 0x13c   :  { %v199_v7 = vsel %vm198_vm1, %v62_v3, %v89_v4 }
 0x13f   :  { %v116_v5 = vpop.xlane.xlu0 %115 }
 0x140   :  { %v201_v9 = vsel %vm200_vm2, %v199_v7, %v116_v5 }
 0x143   :  { %v143_v6 = vpop.xlane.xlu1 %142 }
 0x144   :  { %v203_v10 = vsel %vm202_vm3, %v201_v9, %v143_v6 }
 0x147   :  { %v170_v8 = vpop.xlane.xlu0 %169 }
 0x148   :  { %v205_v12 = vsel %vm204_vm4, %v203_v10, %v170_v8 }
 0x14b   :  { %v197_v13 = vpop.xlane.xlu1 %196 }
 0x14c   :  { %v207_v14 = vsel %vm206_vm5, %v205_v12, %v197_v13 }
 0x14d   :  { %v209_v15 = vmax.f32 %v208_v11, %v207_v14 }
 0x14f   :  { %211 = vst.msk [vmem:[#allocation5] sm:$0x3] %vm27_vm0, %v209_v15 }
 0x150   :  { %277 = shalt.err (!%p274_p12)
}
 0x151   :  { %s278_s24 = scalar_lea.hbm %s358_s1, 32 }
 0x152   :  { %p279_p13 = scmp.ne.s32.totalorder %s358_s1, %s278_s24  ;;  %p282_p0 = scmp.lt.u32.totalorder %s278_s24, %s358_s1 }
 0x154   :  { %p284_p1 = pnand %p282_p0, %p279_p13 }
 0x156   :  { %287 = shalt.err (!%p284_p1)
}
 0x157   :  { %221 = dma.vmem_to_hbm [thread:$0]  %s219_s20, 32, %s358_s1, [#allocation4]  }
 0x158   :  { %290 = dma.done.wait [#allocation4], 32  }
 0x159   :  { %291 = vsyncadd [#allocation4], 4294967264 }
 0x15a   :  { %225 = vsyncpa [#allocation3], 1 }
 0x15b   :  { %226 = vsyncpa [#allocation4], 1 }

</bundles_post_ra>
